<compile_context>
chip_gen: v7x
topology: tpu7x:2x2x1
jax: 0.10.0
libtpu: 0.0.40
codegen_flags: <defaults>
</compile_context>

<pallas_src>
import functools

import jax
import jax.numpy as jnp
from jax.experimental import pallas as pl
from jax.experimental.pallas import tpu as pltpu

# MXU compute dtype for activations/weights.  float32 keeps the strict 1e-3
# check against the XLA reference; on v6e/v7x set jnp.bfloat16 for ~2x MXU
# rate and half the activation HBM/VMEM bytes (accumulation stays f32).
COMPUTE_DTYPE = jnp.float32

_VMEM_LIMIT_BYTES = 32 * 1024 * 1024      # safe on v5e/v6e (128 MiB) and v7x (64 MiB)
_BLOCK_BYTE_BUDGET = 4 * 1024 * 1024      # per-block target -> hundreds of MXU rows/tile


def _pick_row_tile(rows, bytes_per_row, forced=None):
    """Largest row tile dividing `rows` that fits the block budget.  If it
    actually splits, it must be a multiple of 8 so the 8-row halo block stays
    block-aligned; otherwise fall back to a single full-height tile."""
    if forced is not None:
        t = min(forced, rows)
        if t < rows and (t % 8 != 0 or rows % t != 0):
            return rows
        return t
    if rows * bytes_per_row <= _BLOCK_BYTE_BUDGET:
        return rows
    best = None
    for d in range(8, rows + 1, 8):
        if rows % d == 0 and d * bytes_per_row <= _BLOCK_BYTE_BUDGET:
            best = d
    return best if best is not None else rows


# ----------------------------------------------------------------------------
# Pallas kernel 1: 1x1 lateral conv  (+ bias, + fused 2x-row-upsampled residual)
# ----------------------------------------------------------------------------
def _lateral_kernel(*refs, has_res):
    if has_res:
        x_ref, w_ref, b_ref, r_ref, o_ref = refs
    else:
        x_ref, w_ref, b_ref, o_ref = refs
    th, w, cin = x_ref.shape
    f = o_ref.shape[-1]
    x2 = x_ref[...].reshape(th * w, cin)
    acc = jnp.dot(x2, w_ref[...], preferred_element_type=jnp.float32)
    acc = acc + b_ref[...]
    acc = acc.reshape(th, w, f)
    if has_res:
        # residual comes in at half row resolution; 2x nearest row-repeat is a
        # leading-dim broadcast+reshape (no sublane/lane movement).
        r = r_ref[...]                       # (th//2, w, f)
        acc = acc + jnp.repeat(r, 2, axis=0)
    o_ref[...] = acc.astype(o_ref.dtype)


def conv1x1(x, w_mat, b_row, residual_half=None, row_tile=None):
    """x: (N,H,W,Cin) NHWC; w_mat: (Cin,F); b_row: (1,F) f32;
    residual_half: (N, H//2, W, F) (already 2x-repeated along W) or None."""
    n, h, wdim, cin = x.shape
    f = w_mat.shape[1]
    has_res = residual_half is not None
    bytes_per_row = (wdim * cin + 2 * wdim * f) * 4
    th = _pick_row_tile(h, bytes_per_row, row_tile)
    if has_res:
        assert h % 2 == 0 and th % 2 == 0
    xc = x.astype(COMPUTE_DTYPE)

    in_specs = [
        pl.BlockSpec((None, th, wdim, cin), lambda b, i: (b, i, 0, 0)),
        pl.BlockSpec((cin, f), lambda b, i: (0, 0)),
        pl.BlockSpec((1, f), lambda b, i: (0, 0)),
    ]
    args = [xc, w_mat, b_row]
    if has_res:
        in_specs.append(
            pl.BlockSpec((None, th // 2, wdim, f), lambda b, i: (b, i, 0, 0)))
        args.append(residual_half)

    out = pl.pallas_call(
        functools.partial(_lateral_kernel, has_res=has_res),
        out_shape=jax.ShapeDtypeStruct((n, h, wdim, f), jnp.float32),
        grid=(n, h // th),
        in_specs=in_specs,
        out_specs=pl.BlockSpec((None, th, wdim, f), lambda b, i: (b, i, 0, 0)),
        compiler_params=pltpu.CompilerParams(
            dimension_semantics=("parallel", "parallel"),
            vmem_limit_bytes=_VMEM_LIMIT_BYTES),
    )(*args)
    return out


# ----------------------------------------------------------------------------
# Pallas kernel 2: 3x3 conv as 9 in-kernel tap matmuls (stride 1 or 2)
# ----------------------------------------------------------------------------
def _conv3x3_kernel(*refs, taps, out_h, out_w, cin, halo_rows, relu_in, has_halo):
    if has_halo:
        x_ref, xh_ref, w_ref, b_ref, o_ref = refs
    else:
        x_ref, w_ref, b_ref, o_ref = refs
    cout = o_ref.shape[-1]
    x = x_ref[...]
    if has_halo:
        x = jnp.concatenate([x, xh_ref[...][:halo_rows]], axis=0)
    if relu_in:
        # ReLU on the loaded tile once (1x VPU work, hidden under the MXU);
        # it commutes with the zero padding / space-to-depth done outside.
        x = jnp.maximum(x, 0.0)
    acc = None
    for t, (ro, co, ch) in enumerate(taps):
        xt = x[ro:ro + out_h, co:co + out_w, ch:ch + cin]
        xt = xt.reshape(out_h * out_w, cin)
        part = jnp.dot(xt, w_ref[t], preferred_element_type=jnp.float32)
        acc = part if acc is None else acc + part
    acc = acc + b_ref[...]
    o_ref[...] = acc.reshape(out_h, out_w, cout).astype(o_ref.dtype)


def conv3x3(x, w_taps, b_row, stride=1, relu_input=False, row_tile=None):
    """3x3 conv, padding=1.  x: (N,H,W,Cin) NHWC.
    w_taps: (9, Cin, Cout) with tap t = dh*3+dw holding w[:, :, dh, dw].T."""
    n, h, wdim, cin = x.shape
    cout = w_taps.shape[-1]
    assert stride in (1, 2)
    if stride == 1:
        ho, wo = h, wdim
        xk = jnp.pad(x, ((0, 0), (1, 1), (1, 1), (0, 0)))      # (N, H+2, W+2, Cin)
        halo_rows = 2
        wx, cx = wdim + 2, cin
        taps = [(dh, dw, 0) for dh in range(3) for dw in range(3)]
    else:
        assert h % 2 == 0 and wdim % 2 == 0
        ho, wo = h // 2, wdim // 2
        xp = jnp.pad(x, ((0, 0), (1, 1), (1, 1), (0, 0)))
        # space-to-depth(2): strided taps -> unit-stride taps on 4*Cin channels.
        xk = xp.reshape(n, ho + 1, 2, wo + 1, 2, cin)
        xk = xk.transpose(0, 1, 3, 2, 4, 5).reshape(n, ho + 1, wo + 1, 4 * cin)
        halo_rows = 1
        wx, cx = wo + 1, 4 * cin
        taps = [(dh // 2, dw // 2, ((dh % 2) * 2 + (dw % 2)) * cin)
                for dh in range(3) for dw in range(3)]
    xk = xk.astype(COMPUTE_DTYPE)

    bytes_per_row = (wx * cx + wo * cout) * 4
    th = _pick_row_tile(ho, bytes_per_row, row_tile)
    n_tiles = ho // th
    has_halo = n_tiles > 1

    if has_halo:
        # bottom-pad so the 8-row halo block of the last tile stays in bounds
        pad_to = n_tiles * th + 8
        xk = jnp.pad(xk, ((0, 0), (0, pad_to - xk.shape[1]), (0, 0), (0, 0)))
        x_rows = th
    else:
        x_rows = ho + halo_rows          # full (padded / s2d) height in one block

    in_specs = [pl.BlockSpec((None, x_rows, wx, cx), lambda b, i: (b, i, 0, 0))]
    args = [xk]
    if has_halo:
        hb = th // 8
        in_specs.append(
            pl.BlockSpec((None, 8, wx, cx), lambda b, i: (b, (i + 1) * hb, 0, 0)))
        args.append(xk)
    in_specs += [
        pl.BlockSpec((9, cin, cout), lambda b, i: (0, 0, 0)),
        pl.BlockSpec((1, cout), lambda b, i: (0, 0)),
    ]
    args += [w_taps, b_row]

    kern = functools.partial(
        _conv3x3_kernel, taps=taps, out_h=th, out_w=wo, cin=cin,
        halo_rows=halo_rows, relu_in=relu_input, has_halo=has_halo)

    out = pl.pallas_call(
        kern,
        out_shape=jax.ShapeDtypeStruct((n, ho, wo, cout), jnp.float32),
        grid=(n, n_tiles),
        in_specs=in_specs,
        out_specs=pl.BlockSpec((None, th, wo, cout), lambda b, i: (b, i, 0, 0)),
        compiler_params=pltpu.CompilerParams(
            dimension_semantics=("parallel", "parallel"),
            vmem_limit_bytes=_VMEM_LIMIT_BYTES),
    )(*args)
    return out


# ----------------------------------------------------------------------------
# Parameter prep: matmul-ready weight layouts, computed once.
# ----------------------------------------------------------------------------
def prepare_params(p):
    q = {}

    def mat1x1(w):      # (Cout,Cin,1,1) -> (Cin,Cout)
        return jnp.transpose(w.reshape(w.shape[0], w.shape[1])).astype(COMPUTE_DTYPE)

    def taps3x3(w):     # (Cout,Cin,3,3) -> (9,Cin,Cout), tap t = dh*3+dw
        return (jnp.transpose(w, (2, 3, 1, 0))
                .reshape(9, w.shape[1], w.shape[0]).astype(COMPUTE_DTYPE))

    def brow(b):
        return b.reshape(1, -1).astype(jnp.float32)

    for lvl in ('P5_1', 'P4_1', 'P3_1'):
        q[lvl + '_w'] = mat1x1(p[lvl + '_w'])
        q[lvl + '_b'] = brow(p[lvl + '_b'])
    for lvl in ('P5_2', 'P4_2', 'P3_2', 'P6', 'P7_2'):
        q[lvl + '_w'] = taps3x3(p[lvl + '_w'])
        q[lvl + '_b'] = brow(p[lvl + '_b'])
    return q


# ----------------------------------------------------------------------------
# PyramidFeatures forward (NHWC)
# ----------------------------------------------------------------------------
def pyramid_features_forward(q, C3, C4, C5):
    # TODO(synk): per-level 1x1+3x3 fusion into one pallas_call (fewer launches)
    # skipped: the 3x3 halo of the lateral result needs in-kernel recompute.
    P5_x = conv1x1(C5, q['P5_1_w'], q['P5_1_b'])
    P5_out = conv3x3(P5_x, q['P5_2_w'], q['P5_2_b'], stride=1)

    # lateral + upsampled residual fused into the 1x1 kernel (half-row blocks,
    # 2x row repeat in-kernel; 2x column repeat stays in the wrapper).
    P5_wup = jnp.repeat(P5_x, 2, axis=2)
    P4_x = conv1x1(C4, q['P4_1_w'], q['P4_1_b'], residual_half=P5_wup)
    P4_out = conv3x3(P4_x, q['P4_2_w'], q['P4_2_b'], stride=1)

    P4_wup = jnp.repeat(P4_x, 2, axis=2)
    P3_x = conv1x1(C3, q['P3_1_w'], q['P3_1_b'], residual_half=P4_wup)
    P3_out = conv3x3(P3_x, q['P3_2_w'], q['P3_2_b'], stride=1)

    P6_out = conv3x3(C5, q['P6_w'], q['P6_b'], stride=2)
    P7_out = conv3x3(P6_out, q['P7_2_w'], q['P7_2_b'], stride=2, relu_input=True)
    return [P3_out, P4_out, P5_out, P6_out, P7_out]


# ----------------------------------------------------------------------------
# Pure-JAX reference (lax conv) for correctness checks
# ----------------------------------------------------------------------------
def _ref_conv(x, w, b, stride, pad):
    whwio = jnp.transpose(w, (2, 3, 1, 0))
    y = jax.lax.conv_general_dilated(
        x, whwio, (stride, stride), [(pad, pad), (pad, pad)],
        dimension_numbers=('NHWC', 'HWIO', 'NHWC'))
    return y + b.reshape(1, 1, 1, -1)


def _upsample2x(x):
    return jnp.repeat(jnp.repeat(x, 2, axis=1), 2, axis=2)


def pyramid_features_reference(p, C3, C4, C5):
    P5_x = _ref_conv(C5, p['P5_1_w'], p['P5_1_b'], 1, 0)
    P5_up = _upsample2x(P5_x)
    P5_out = _ref_conv(P5_x, p['P5_2_w'], p['P5_2_b'], 1, 1)
    P4_x = _ref_conv(C4, p['P4_1_w'], p['P4_1_b'], 1, 0) + P5_up
    P4_up = _upsample2x(P4_x)
    P4_out = _ref_conv(P4_x, p['P4_2_w'], p['P4_2_b'], 1, 1)
    P3_x = _ref_conv(C3, p['P3_1_w'], p['P3_1_b'], 1, 0) + P4_up
    P3_out = _ref_conv(P3_x, p['P3_2_w'], p['P3_2_b'], 1, 1)
    P6_out = _ref_conv(C5, p['P6_w'], p['P6_b'], 2, 1)
    P7_out = _ref_conv(jnp.maximum(P6_out, 0.0), p['P7_2_w'], p['P7_2_b'], 2, 1)
    return [P3_out, P4_out, P5_out, P6_out, P7_out]


# ----------------------------------------------------------------------------
def init_params(key, c3, c4, c5, f):
    shapes = {
        'P5_1_w': (f, c5, 1, 1), 'P5_1_b': (f,),
        'P5_2_w': (f, f, 3, 3),  'P5_2_b': (f,),
        'P4_1_w': (f, c4, 1, 1), 'P4_1_b': (f,),
        'P4_2_w': (f, f, 3, 3),  'P4_2_b': (f,),
        'P3_1_w': (f, c3, 1, 1), 'P3_1_b': (f,),
        'P3_2_w': (f, f, 3, 3),  'P3_2_b': (f,),
        'P6_w':   (f, c5, 3, 3), 'P6_b':   (f,),
        'P7_2_w': (f, f, 3, 3),  'P7_2_b': (f,),
    }
    params = {}
    keys = jax.random.split(key, len(shapes))
    for k, (name, shp) in zip(keys, sorted(shapes.items())):
        params[name] = 0.05 * jax.random.normal(k, shp, jnp.float32)
    return params


if __name__ == "__main__":
    key = jax.random.PRNGKey(0)
    k1, k2, k3, k4, k5, k6 = jax.random.split(key, 6)

    C3_size, C4_size, C5_size, F = 32, 64, 128, 128
    # PyTorch-convention NCHW inputs (small shapes)
    C3_nchw = jax.random.normal(k1, (2, C3_size, 16, 16), jnp.float32)
    C4_nchw = jax.random.normal(k2, (2, C4_size, 8, 8), jnp.float32)
    C5_nchw = jax.random.normal(k3, (2, C5_size, 4, 4), jnp.float32)

    # NCHW -> NHWC for the kernel layout
    C3 = jnp.transpose(C3_nchw, (0, 2, 3, 1))
    C4 = jnp.transpose(C4_nchw, (0, 2, 3, 1))
    C5 = jnp.transpose(C5_nchw, (0, 2, 3, 1))

    params = init_params(k4, C3_size, C4_size, C5_size, F)
    q = prepare_params(params)

    outs = pyramid_features_forward(q, C3, C4, C5)
    outs = [jax.block_until_ready(o) for o in outs]

    refs = pyramid_features_reference(params, C3, C4, C5)
    for name, o, r in zip(["P3", "P4", "P5", "P6", "P7"], outs, refs):
        assert o.shape == r.shape, (name, o.shape, r.shape)
        assert jnp.allclose(o, r, atol=1e-3, rtol=1e-3), name

    # Explicitly exercise the multi-row-tile (halo) paths, stride 1 and stride 2.
    xa = jax.random.normal(k5, (2, 16, 16, F), jnp.float32)
    ya = jax.block_until_ready(
        conv3x3(xa, q['P3_2_w'], q['P3_2_b'], stride=1, row_tile=8))
    ra = _ref_conv(xa, params['P3_2_w'], params['P3_2_b'], 1, 1)
    assert jnp.allclose(ya, ra, atol=2e-3, rtol=2e-3), "tiled stride-1"

    xb = jax.random.normal(k6, (1, 32, 32, F), jnp.float32)
    yb = jax.block_until_ready(
        conv3x3(xb, q['P7_2_w'], q['P7_2_b'], stride=2, relu_input=True, row_tile=8))
    rb = _ref_conv(jnp.maximum(xb, 0.0), params['P7_2_w'], params['P7_2_b'], 2, 1)
    assert jnp.allclose(yb, rb, atol=2e-3, rtol=2e-3), "tiled stride-2"

    print("KERNEL_OK")
</pallas_src>

<mosaic_0001>
module attributes {stable_mosaic.version = 11 : i64} {
  func.func @_lateral_kernel(%arg0: i32, %arg1: i32, %arg2: memref<1x4x4x128xf32, #tpu.memory_space<vmem>>, %arg3: memref<128x128xf32, #tpu.memory_space<vmem>>, %arg4: memref<1x128xf32, #tpu.memory_space<vmem>>, %arg5: memref<1x4x4x128xf32, #tpu.memory_space<vmem>>) attributes {dimension_semantics = [#tpu.dimension_semantics<parallel>, #tpu.dimension_semantics<parallel>], iteration_bounds = array<i64: 2, 1>, scalar_prefetch = 0 : i64, scratch_operands = 0 : i64, tpu.core_type = #tpu.core_type<tc>, window_params = [{transform_indices = @transform_0, window_bounds = array<i64: 1, 4, 4, 128>}, {pipeline_mode = #tpu.pipeline_mode<synchronous>, transform_indices = @transform_1, window_bounds = array<i64: 128, 128>}, {pipeline_mode = #tpu.pipeline_mode<synchronous>, transform_indices = @transform_2, window_bounds = array<i64: 1, 128>}, {transform_indices = @transform_3, window_bounds = array<i64: 1, 4, 4, 128>}]} {
    %c0 = arith.constant 0 : index
    %c0_0 = arith.constant 0 : index
    %c0_1 = arith.constant 0 : index
    %c0_2 = arith.constant 0 : index
    %0 = vector.load %arg2[%c0, %c0_0, %c0_1, %c0_2] : memref<1x4x4x128xf32, #tpu.memory_space<vmem>>, vector<1x4x4x128xf32>
    %1 = vector.shape_cast %0 : vector<1x4x4x128xf32> to vector<4x4x128xf32>
    %2 = vector.shape_cast %1 : vector<4x4x128xf32> to vector<16x128xf32>
    %c0_3 = arith.constant 0 : index
    %c0_4 = arith.constant 0 : index
    %3 = vector.load %arg3[%c0_3, %c0_4] : memref<128x128xf32, #tpu.memory_space<vmem>>, vector<128x128xf32>
    %cst = arith.constant dense<0.000000e+00> : vector<16x128xf32>
    %4 = tpu.matmul %2, %3, %cst {dimension_numbers = #tpu.dot_dimension_numbers<[1], [0], [0], [1], [0, 0, 1, 1], [], []>} : vector<16x128xf32>, vector<128x128xf32>, vector<16x128xf32> -> vector<16x128xf32>
    %c0_5 = arith.constant 0 : index
    %c0_6 = arith.constant 0 : index
    %5 = vector.load %arg4[%c0_5, %c0_6] : memref<1x128xf32, #tpu.memory_space<vmem>>, vector<1x128xf32>
    %6 = vector.broadcast %5 : vector<1x128xf32> to vector<16x128xf32>
    %7 = arith.addf %4, %6 : vector<16x128xf32>
    %8 = vector.shape_cast %7 : vector<16x128xf32> to vector<4x4x128xf32>
    %c0_7 = arith.constant 0 : index
    %c0_8 = arith.constant 0 : index
    %c0_9 = arith.constant 0 : index
    %c0_10 = arith.constant 0 : index
    %9 = vector.load %arg5[%c0_7, %c0_8, %c0_9, %c0_10] : memref<1x4x4x128xf32, #tpu.memory_space<vmem>>, vector<1x4x4x128xf32>
    %10 = vector.shape_cast %9 : vector<1x4x4x128xf32> to vector<4x4x128xf32>
    %11 = vector.shape_cast %8 : vector<4x4x128xf32> to vector<1x4x4x128xf32>
    tpu.vector_store %arg5[%c0_7, %c0_8, %c0_9, %c0_10], %11 {strides = array<i32>} : memref<1x4x4x128xf32, #tpu.memory_space<vmem>>, vector<1x4x4x128xf32>,
    return
  }
  func.func @transform_0(%arg0: i32, %arg1: i32) -> (i32, i32, i32, i32) {
    %c0_i32 = arith.constant 0 : i32
    %c0_i32_0 = arith.constant 0 : i32
    %c0_i32_1 = arith.constant 0 : i32
    return %arg0, %arg1, %c0_i32, %c0_i32_0 : i32, i32, i32, i32
  }
  func.func @transform_1(%arg0: i32, %arg1: i32) -> (i32, i32) {
    %c0_i32 = arith.constant 0 : i32
    %c0_i32_0 = arith.constant 0 : i32
    %c0_i32_1 = arith.constant 0 : i32
    return %c0_i32, %c0_i32_0 : i32, i32
  }
  func.func @transform_2(%arg0: i32, %arg1: i32) -> (i32, i32) {
    %c0_i32 = arith.constant 0 : i32
    %c0_i32_0 = arith.constant 0 : i32
    %c0_i32_1 = arith.constant 0 : i32
    return %c0_i32, %c0_i32_0 : i32, i32
  }
  func.func @transform_3(%arg0: i32, %arg1: i32) -> (i32, i32, i32, i32) {
    %c0_i32 = arith.constant 0 : i32
    %c0_i32_0 = arith.constant 0 : i32
    %c0_i32_1 = arith.constant 0 : i32
    return %arg0, %arg1, %c0_i32, %c0_i32_0 : i32, i32, i32, i32
  }
}

</mosaic_0001>

<bundles_post_ra>
// kernel: tpu_custom_call.1
= control target key start
LH: loop header
LB: loop body
LE: loop exit
PB: predicated region body
PF: predicated region fallthrough
CT: control target
= control target key end

     0   :  { %8 = vsyncpa [#allocation3], 0  ;;  %s1048_s0 = inlined_call_operand.hbm [shape: f32[2,4,4,128], index: 0, kind: input, shape index: {}]   ;;  %s1049_s1 = inlined_call_operand.hbm [shape: f32[128,128], index: 1, kind: input, shape index: {}]   ;;  %s1050_s2 = inlined_call_operand.vmem [shape: f32[1,128], index: 2, kind: input, shape index: {}]   ;;  %s1051_s3 = inlined_call_operand.hbm [shape: f32[2,4,4,128], index: 3, kind: output, shape index: {}]  }
   0x1   :  { %10 = vsyncpa [#allocation3 + $0x1], 0 }
   0x2   :  { %11 = vsyncpa [#allocation6], 0 }
   0x3   :  { %12 = vsyncpa [#allocation4], 0 }
   0x4   :  { %14 = vsyncpa [#allocation4 + $0x1], 0  ;;  %s818_s12 = smov 0   ;;  %s820_s13 = smov 0  }
   0x5   :  { %s822_s14 = smov 0   ;;  %s824_s15 = smov 0  }
   0x6   :  { %s826_s16 = smov 0   ;;  %s828_s17 = smov 0  }
   0x7 LB: > { %s457_s18 = sadd.s32 4294967295, %s787_s17   ;;  %s458_s19 = sadd.s32 4294967294, %s787_s17   ;;  %s787_s17 = sphi %s828_s17, %s20_s17   ;;  %s783_s16 = sphi %s826_s16, %s1075_s16   ;;  %s779_s15 = sphi %s824_s15, %s1074_s15   ;;  %s775_s14 = sphi %s822_s14, %s1073_s14   ;;  %s771_s13 = sphi %s820_s13, %s1072_s13   ;;  %s767_s12 = sphi %s818_s12, %s1071_s12  }
   0x8   : > { %p54_p0 = scmp.ne.s32.totalorder %s771_s13, %s767_s12  ;;  %p852_p1 = scmp.eq.s32.totalorder %s457_s18, 0 }
   0x9   : > { %p856_p2 = scmp.eq.s32.totalorder %s457_s18, 1  ;;  %p128_p3 = scmp.eq.s32.totalorder %s458_s19, 1 }
   0xa   : > { %s1056_s20 = scalar_select %p852_p1, 1, 0 }
   0xb   : > { %s1057_s21 = scalar_select %p856_p2, 1, 0 }
   0xc   : > { %p862_p4 = por %p852_p1, %p54_p0  ;;  %p459_p5 = scmp.ge.s32.totalorder %s787_s17, 1 }
   0xd   : > { %p867_p6 = por %p128_p3, %p54_p0  ;;  %p135_p7 = scmp.lt.s32.totalorder %s787_s17, 3 }
   0xe   : > { %s1058_s22 = scalar_select %p862_p4, 1, 0 }
   0xf   : > { %s1059_s23 = scalar_select %p867_p6, 1, 0 }
  0x10   : > { %p872_p8 = pnand %p459_p5, %p135_p7  ;;  %s789_s25 = smov [#allocation5]  }
  0x11   : > { %s147_s26 = sshll.u32 %s789_s25, 4  ;;  %s32_s28 = sadd.s32 1, %s783_s16  ;;  %s148_s26 = int_to_ptr.vmem [resolvable:$true] %s147_s26 }
  0x12   : > { %s1060_s24 = scalar_select %p872_p8, 1, 0 }
  0x13   : > { %p570_p9 = pneg %p872_p8  ;;  %s643_s4 = scalar_lea.hbm %s1049_s1, 2048 }
  0x14   : > { %p644_p12 = scmp.ne.s32.totalorder %s1049_s1, %s643_s4  ;;  %p650_p5 = scmp.lt.u32.totalorder %s643_s4, %s1049_s1 }
  0x15   : > { %p881_p11 = pnand %p570_p9, %p852_p1 }
  0x17   : > { %p645_p13 = pneg %p881_p11 }
  0x19   : > { %p646_p0 = pnand %p645_p13, %p644_p12 }
  0x1b   : > { %p647_p3 = pneg %p646_p0 }
  0x1d   : > { %p652_p7 = pnand %p650_p5, %p647_p3 }
  0x1f   : > { %655 = shalt.err (!%p652_p7)
}
  0x20   : > { %s656_s9 = scalar_lea.vmem %s148_s26, 2048  ;;  %p664_p1 = scmp.lt.s32.totalorder %s148_s26, %s148_s26 }
  0x21   : > { %p657_p9 = scmp.ne.s32.totalorder %s148_s26, %s656_s9  ;;  %p665_p4 = scmp.lt.s32.totalorder %s656_s9, %s656_s9 }
  0x23   : > { %p659_p10 = pnand %p657_p9, %p645_p13  ;;  %p666_p8 = por %p665_p4, %p664_p1 }
  0x25   : > { %p660_p6 = pneg %p659_p10 }
  0x27   : > { %p667_p2 = pnand %p666_p8, %p660_p6 }
  0x29   : > { %670 = shalt.err (!%p667_p2)
}
  0x2a   : > { %s790_s10 = smov 128   ;;  %s791_s11 = smov 8  }
  0x2b   : > { %573 = dma.hbm_to_vmem [thread:$0]  (!%p881_p11), %s1049_s1, 2048, %s148_s26, [#allocation6], %s790_s10, %s790_s10, %s791_s11  }
  0x2c   : > { %p34_p1 = scmp.ge.s32.totalorder %s32_s28, 2  ;;  %s41_s25 = sadd.s32 1, %s775_s14 }
  0x2d   : > { %p48_p2 = scmp.ne.s32.totalorder %s775_s14, %s771_s13  ;;  %p49_p4 = scmp.eq.s32.totalorder %s787_s17, 0 }
  0x2e   : > { %s1077_s28 = smov (%p34_p1, %s32_s28), 0  ;;  %p1063_p8 = scmp.ne.s32.totalorder %s1057_s21, 0 }
  0x2f   : > { %p908_p6 = por %p49_p4, %p48_p2  ;;  %s36_s27 = ssub.s32 %s783_s16, %s1077_s28 }
  0x30   : > { %p914_p10 = por %p1063_p8, %p48_p2  ;;  %p583_p12 = scmp.lt.s32.totalorder %s787_s17, 2 }
  0x31   : > { %p39_p11 = scmp.eq.s32.totalorder %s36_s27, 0  ;;  %s164_s26 = sand.u32 1, %s775_s14  }
  0x32   : > { %s462_s4 = sshll.u32 %s164_s26, 4  ;;  %s475_s6 = sshll.u32 %s783_s16, 8 }
  0x33   : > { %s923_s5 = scalar_select %p39_p11, %s775_s14, %s41_s25  }
  0x34   : > { %s929_s9 = scalar_lea.hbm %s1048_s0, %s475_s6  ;;  %s168_s21 = scalar_lea.vmem [#allocation2], %s462_s4 }
  0x35   : > { %s177_s10 = sshll.u32 %s168_s21, 4  ;;  %p935_p13 = pnand %p583_p12, %p908_p6  ;;  %s931_s10 = int_to_ptr.vmem [resolvable:$true] %s177_s10 }
  0x36   : > { %s939_s18 = scalar_lea.sflag [#allocation3], %s164_s26  ;;  %s671_s19 = scalar_lea.hbm %s929_s9, 256 }
  0x37   : > { %p672_p0 = scmp.ne.s32.totalorder %s929_s9, %s671_s19  ;;  %p673_p3 = pneg %p935_p13 }
  0x38   : > { %s676_s29 = scalar_lea.hbm %s1048_s0, 512  ;;  %p677_p9 = scmp.lt.u32.totalorder %s929_s9, %s1048_s0 }
  0x39   : > { %p674_p5 = pnand %p673_p3, %p672_p0  ;;  %p678_p1 = scmp.lt.u32.totalorder %s676_s29, %s671_s19 }
  0x3a   : > { %p680_p4 = scmp.lt.u32.totalorder %s671_s19, %s929_s9 }
  0x3b   : > { %p675_p7 = pneg %p674_p5  ;;  %p679_p2 = por %p678_p1, %p677_p9 }
  0x3d   : > { %p681_p6 = por %p680_p4, %p679_p2 }
  0x3f   : > { %p682_p8 = pnand %p681_p6, %p675_p7 }
  0x41   : > { %685 = shalt.err (!%p682_p8)
}
  0x42   : > { %s686_s26 = scalar_lea.vmem %s931_s10, 256  ;;  %s792_s7 = smov [#allocation2]  }
  0x43   : > { %p687_p12 = scmp.ne.s32.totalorder %s931_s10, %s686_s26  ;;  %s691_s8 = sshll.u32 %s792_s7, 4  ;;  %s692_s8 = int_to_ptr.vmem [resolvable:$false] %s691_s8 }
  0x44   : > { %s693_s21 = scalar_lea.vmem %s692_s8, 512  ;;  %p694_p5 = scmp.lt.s32.totalorder %s931_s10, %s692_s8 }
  0x45   : > { %p689_p11 = pnand %p687_p12, %p673_p3  ;;  %p695_p9 = scmp.lt.s32.totalorder %s693_s21, %s686_s26 }
  0x47   : > { %p690_p0 = pneg %p689_p11  ;;  %p696_p1 = por %p695_p9, %p694_p5 }
  0x49   : > { %p697_p2 = pnand %p696_p1, %p690_p0 }
  0x4b   : > { %700 = shalt.err (!%p697_p2)
}
  0x4c   : > { %s793_s19 = smov 64   ;;  %s794_s25 = smov 4  }
  0x4d   : > { %577 = dma.hbm_to_vmem [thread:$0]  (!%p935_p13), %s929_s9, 256, %s931_s10, %s939_s18, %s793_s19, %s793_s19, %s794_s25  }
  0x4e   : > { %p1066_p3 = scmp.ne.s32.totalorder %s1060_s24, 0 }
  0x4f   : > { %s970_s27 = sand.u32 (!%p1066_p3), 1, %s771_s13   ;;  %p1067_p7 = scmp.ne.s32.totalorder (!%p1066_p3), %s1058_s22, 0 }
  0x50   : > { %189 = sbr.rel (%p1066_p3) target bundleno = 358 (0x166), region = 32  ;;  %s466_s29 = sshll.u32 (!%p1066_p3), %s970_s27, 4 }
  0x51   : > { %s192_s4 = scalar_lea.sflag (!%p1066_p3), [#allocation3], %s970_s27  ;;  %s976_s6 = scalar_lea.vmem (!%p1066_p3), [#allocation2], %s466_s29 }
  0x57   : > { %754 = dma.done.wait (%p1067_p7), %s192_s4, 256  }
  0x58   : > { %756 = vsyncadd (%p1067_p7), %s192_s4, 4294967040  ;;  %p1068_p13 = scmp.ne.s32.totalorder %s1056_s20, 0 }
  0x5a   : > { %758 = dma.done.wait (%p1068_p13), [#allocation6], 2048  }
  0x5b   : > { %760 = vsyncadd (%p1068_p13), [#allocation6], 4294965248  ;;  %v228_v0 = vld [vmem:[#allocation5] sm:$0xff]  ;;  %v229_v1 = vld [vmem:[#allocation5 + $0x8] sm:$0xff]  ;;  %s221_s24 = scalar_lea.vmem [#allocation7], %s466_s29  ;;  %s476_s10 = sshll.u32 %s779_s15, 8 }
  0x5c   : > { %v230_v2 = vld [vmem:[#allocation5 + $0x10] sm:$0xff]  ;;  %v530_v3 = vpack.c.bf16 %v229_v1, %v228_v0  ;;  %v231_v4 = vld [vmem:[#allocation5 + $0x18] sm:$0xff]  ;;  %v232_v6 = vld [vmem:[#allocation5 + $0x20] sm:$0xff]  ;;  %s360_s9 = sshll.u32 %s221_s24, 4  ;;  %s999_s26 = scalar_lea.hbm %s1051_s3, %s476_s10  ;;  %s994_s9 = int_to_ptr.vmem [resolvable:$true] %s360_s9 }
  0x5d   : > { %v534_v5 = vpack.c.bf16 %v231_v4, %v230_v2  ;;  %v233_v7 = vld [vmem:[#allocation5 + $0x28] sm:$0xff]  ;;  %v234_v8 = vld [vmem:[#allocation5 + $0x30] sm:$0xff]  ;;  %v235_v10 = vld [vmem:[#allocation5 + $0x38] sm:$0xff]  ;;  %s345_s15 = scalar_lea.sflag [#allocation4], %s970_s27  ;;  %s701_s7 = scalar_lea.vmem %s994_s9, 256 }
  0x5e   : > { %531 = vmatprep.subr.bf16.mxu0 %v530_v3  ;;  %v538_v9 = vpack.c.bf16 %v233_v7, %v232_v6  ;;  %v641_v11 = vld [vmem:[%s976_s6] sm:$0xff]   ;;  %v542_v12 = vpack.c.bf16 %v235_v10, %v234_v8  ;;  %v237_v14 = vld [vmem:[#allocation5 + $0x48] sm:$0xff]  ;;  %v239_v17 = vld [vmem:[#allocation5 + $0x58] sm:$0xff]  ;;  %p702_p4 = scmp.ne.s32.totalorder %s994_s9, %s701_s7  ;;  %s795_s8 = smov [#allocation7]  }
  0x5f   : > { %533 = vmatpush3.bf16.msra.mxu0 %v530_v3  ;;  %527 = vmatprep.mubr.f32.mxu0 %v641_v11  ;;  %v236_v13 = vld [vmem:[#allocation5 + $0x40] sm:$0xff]  ;;  %v238_v16 = vld [vmem:[#allocation5 + $0x50] sm:$0xff]  ;;  %v241_v20 = vld [vmem:[#allocation5 + $0x68] sm:$0xff]  ;;  %s705_s21 = sshll.u32 %s795_s8, 4  ;;  %s706_s21 = int_to_ptr.vmem [resolvable:$false] %s705_s21 }
  0x60   : > { %535 = vmatprep.subr.bf16.mxu0 %v534_v5  ;;  %v546_v15 = vpack.c.bf16 %v237_v14, %v236_v13  ;;  %v550_v18 = vpack.c.bf16 %v239_v17, %v238_v16  ;;  %v240_v19 = vld [vmem:[#allocation5 + $0x60] sm:$0xff]  ;;  %v242_v22 = vld [vmem:[#allocation5 + $0x70] sm:$0xff]  ;;  %v243_v23 = vld [vmem:[#allocation5 + $0x78] sm:$0xff]  ;;  %p703_p6 = pnand %p702_p4, %p914_p10  ;;  %s707_s19 = scalar_lea.vmem %s706_s21, 512 }
  0x61   : > { %v554_v21 = vpack.c.bf16 %v241_v20, %v240_v19  ;;  %v558_v24 = vpack.c.bf16 %v243_v23, %v242_v22  ;;  %v642_v25 = vld [vmem:[%s976_s6 + $0x8] sm:$0xff]   ;;  %v469_v26 = vld [vmem:[%s1050_s2] ss:$0 sm:$0xff]  ;;  %p708_p12 = scmp.lt.s32.totalorder %s994_s9, %s706_s21  ;;  %p709_p11 = scmp.lt.s32.totalorder %s707_s19, %s701_s7 }
  0x62   : > { %p704_p8 = pneg %p703_p6 }
  0x63   : > { %537 = vmatpush3.bf16.msra.mxu0 %v534_v5  ;;  %p710_p0 = por %p709_p11, %p708_p12 }
  0x64   : > { %539 = vmatprep.subr.bf16.mxu0 %v538_v9 }
  0x65   : > { %p711_p5 = pnand %p710_p0, %p704_p8 }
  0x67   : > { %541 = vmatpush3.bf16.msra.mxu0 %v538_v9 }
  0x68   : > { %543 = vmatprep.subr.bf16.mxu0 %v542_v12 }
  0x6b   : > { %545 = vmatpush3.bf16.msra.mxu0 %v542_v12 }
  0x6c   : > { %547 = vmatprep.subr.bf16.mxu0 %v546_v15 }
  0x6f   : > { %549 = vmatpush3.bf16.msra.mxu0 %v546_v15 }
  0x70   : > { %551 = vmatprep.subr.bf16.mxu0 %v550_v18 }
  0x73   : > { %553 = vmatpush3.bf16.msra.mxu0 %v550_v18 }
  0x74   : > { %555 = vmatprep.subr.bf16.mxu0 %v554_v21 }
  0x77   : > { %557 = vmatpush3.bf16.msra.mxu0 %v554_v21 }
  0x78   : > { %559 = vmatprep.subr.bf16.mxu0 %v558_v24 }
  0x7b   : > { %561 = vmatpush3.bf16.msra.mxu0 %v558_v24 }
  0x7e   : > { %528 = vmatmul.mubr.f32.vlgmr.msra.gmra.mrb[0].mxu0 %v642_v25 }
 0x151   : > { %v529_v27 = vpop.f32.mrb[0].mxu0 }
 0x152   : > { %v331_v28 = vadd.f32 %v529_v27, %v469_v26  ;;  %v325_v29 = vpop.f32.mrb[1].mxu0 }
 0x153   : > { %v326_v30 = vadd.f32 %v469_v26, %v325_v29 }
 0x154   : > { %v337_v31 = vcombine.high %v331_v28, %v331_v28  ;;  %342 = vst [vmem:[%s221_s24 + $0x8] sm:$0xf] %v331_v28 }
 0x155   : > { %v336_v32 = vcombine.high %v326_v30, %v326_v30  ;;  %340 = vst [vmem:[%s221_s24] sm:$0xf] %v326_v30 }
 0x156   : > { %343 = vst [vmem:[%s221_s24 + $0xc] sm:$0xf] %v337_v31 }
 0x157   : > { %341 = vst [vmem:[%s221_s24 + $0x4] sm:$0xf] %v336_v32 }
 0x158   : > { %714 = shalt.err (!%p711_p5)
}
 0x159   : > { %s715_s25 = scalar_lea.hbm %s999_s26, 256  ;;  %s719_s6 = scalar_lea.hbm %s1051_s3, 512 }
 0x15a   : > { %p716_p9 = scmp.ne.s32.totalorder %s999_s26, %s715_s25  ;;  %p720_p3 = scmp.lt.u32.totalorder %s999_s26, %s1051_s3 }
 0x15b   : > { %p721_p7 = scmp.lt.u32.totalorder %s719_s6, %s715_s25  ;;  %p723_p4 = scmp.lt.u32.totalorder %s715_s25, %s999_s26 }
 0x15c   : > { %p717_p1 = pnand %p716_p9, %p914_p10 }
 0x15d   : > { %p722_p13 = por %p721_p7, %p720_p3 }
 0x15e   : > { %p718_p2 = pneg %p717_p1 }
 0x15f   : > { %p724_p6 = por %p723_p4, %p722_p13 }
 0x161   : > { %p725_p8 = pnand %p724_p6, %p718_p2 }
 0x163   : > { %728 = shalt.err (!%p725_p8)
}
 0x164   : > { %s796_s24 = smov 64   ;;  %s797_s10 = smov 4  }
 0x165   : > { %568 = dma.vmem_to_hbm [thread:$0]  (%p914_p10), %s994_s9, 256, %s999_s26, %s345_s15, %s796_s24, %s796_s24, %s797_s10  }
 0x166 PF: > { %s375_s11 = sand.u32 1, %s767_s12   ;;  %p1069_p12 = scmp.ne.s32.totalorder %s1059_s23, 0 }
 0x167   : > { %p1070_p11 = scmp.ge.s32.totalorder %s787_s17, 2  ;;  %s376_s18 = scalar_lea.sflag [#allocation4], %s375_s11 }
 0x169   : > { %p579_p0 = pnand %p1070_p11, %p1069_p12 }
 0x16b   : > { %762 = dma.done.wait (!%p579_p0), %s376_s18, 256  }
 0x16c   : > { %764 = vsyncadd (!%p579_p0), %s376_s18, 4294967040  ;;  %s20_s17 = sadd.s32 1, %s787_s17   ;;  %s1071_s12 = smov %s771_s13 }
 0x16d   : > { %p17_p5 = scmp.ge.s32.totalorder %s20_s17, 4   ;;  %s1072_s13 = smov %s775_s14 }
 0x16e   : > { %s1073_s14 = smov %s923_s5  ;;  %s1074_s15 = smov %s783_s16 }
 0x16f   : > { %s1075_s16 = smov %s1077_s28  ;;  %19 = sbr.rel (!%p17_p5) target bundleno = 7 (0x7), region = 81 }
 0x176   :  { %381 = vsyncpa [#allocation3], 1 }
 0x177   :  { %383 = vsyncpa [#allocation3 + $0x1], 1 }
 0x178   :  { %384 = vsyncpa [#allocation6], 1 }
 0x179   :  { %385 = vsyncpa [#allocation4], 1 }
 0x17a   :  { %387 = vsyncpa [#allocation4 + $0x1], 1 }

</bundles_post_ra>
